<compile_context>
chip_gen: v5e
topology: v5e:2x2
jax: 0.10.0
libtpu: 0.0.40
codegen_flags: <defaults>
</compile_context>

<pallas_src>
import jax
import jax.numpy as jnp
from jax.experimental import pallas as pl
from jax.experimental.pallas import tpu as pltpu


_LANES = 128
_EPS = 1e-5
_PAD_TIME = 2880.0   # corrected time_left of padding rows == 1.0 exactly
_MAX_BLOCK_ROWS = 2048   # 1 MiB per-array block; ~8 MiB live in pass 2 w/ dbl-buf


def _round_up(v, m):
    return ((v + m - 1) // m) * m


def _corrected_time(t_raw):
    """Closed form of `for _ in range(10): t[t <= 0] += 300`, then /2880."""
    k = jnp.where(t_raw <= 0.0,
                  jnp.minimum(jnp.floor(-t_raw / 300.0) + 1.0, 10.0),
                  0.0)
    return (t_raw + 300.0 * k) * (1.0 / 2880.0)


def _stats_kernel(sa_ref, sb_ref, tm_ref, part_ref):
    """Per-block, per-lane partial sums for the global BatchNorm statistics."""
    d = sa_ref[...] - sb_ref[...]          # score_diff, (br, 128)
    t = _corrected_time(tm_ref[...])       # time_left,  (br, 128)
    part_ref[0, 0:1, :] = jnp.sum(d, axis=0, keepdims=True)
    part_ref[0, 1:2, :] = jnp.sum(d * d, axis=0, keepdims=True)
    part_ref[0, 2:3, :] = jnp.sum(t, axis=0, keepdims=True)
    part_ref[0, 3:4, :] = jnp.sum(t * t, axis=0, keepdims=True)
    part_ref[0, 4:8, :] = jnp.zeros((4, _LANES), jnp.float32)


def _head_kernel(c_ref, sa_ref, sb_ref, tm_ref, o_ref):
    """Elementwise head with BN + both Linear(2,1) folded into 6 scalars."""
    # read each SMEM scalar exactly once
    c1 = c_ref[0]; c2 = c_ref[1]; c3 = c_ref[2]
    c4 = c_ref[3]; c5 = c_ref[4]; c6 = c_ref[5]
    d = sa_ref[...] - sb_ref[...]
    t = _corrected_time(tm_ref[...])
    order_1 = c1 * d + c2 * t + c3
    order_2 = (c4 * d + c5 * t + c6) * jax.lax.rsqrt(t)   # / sqrt(time_left), EUP
    o_ref[...] = jax.nn.sigmoid(order_1 + order_2)


def pownet_forward(x, params):
    """x: (N, 3) f32 [score_a, score_b, time]; params: (10,) f32 -> (N, 1) f32.

    params layout: [bn_w0, bn_w1, bn_b0, bn_b1, w1_0, w1_1, b1, w2_0, w2_1, b2]
    """
    n = x.shape[0]
    x = x.astype(jnp.float32)
    params = params.astype(jnp.float32)

    # ---- lane-dense padded layout ------------------------------------------
    rows = pl.cdiv(n, _LANES)
    br = min(_MAX_BLOCK_ROWS, max(8, _round_up(rows, 8)))   # block rows
    padded_rows = _round_up(rows, br)
    padded_n = padded_rows * _LANES
    pad = padded_n - n
    grid = padded_rows // br

    sa = jnp.pad(x[:, 0], (0, pad)).reshape(padded_rows, _LANES)
    sb = jnp.pad(x[:, 1], (0, pad)).reshape(padded_rows, _LANES)
    tm = jnp.pad(x[:, 2], (0, pad),
                 constant_values=_PAD_TIME).reshape(padded_rows, _LANES)

    blk = pl.BlockSpec((br, _LANES), lambda i: (i, 0))

    # ---- pass 1: tiled partial sums (fully parallel grid) -------------------
    parts = pl.pallas_call(
        _stats_kernel,
        out_shape=jax.ShapeDtypeStruct((grid, 8, _LANES), jnp.float32),
        grid=(grid,),
        in_specs=[blk, blk, blk],
        out_specs=pl.BlockSpec((1, 8, _LANES), lambda i: (i, 0, 0)),
        compiler_params=pltpu.CompilerParams(
            dimension_semantics=("parallel",)),
    )(sa, sb, tm)

    sums = jnp.sum(parts[:, :4, :], axis=(0, 2))     # (4,)
    inv_n = 1.0 / float(n)
    sum_d, sum_d2 = sums[0], sums[1]
    # padding rows contribute exactly 1.0 each to both time sums -> subtract.
    sum_t = sums[2] - float(pad)
    sum_t2 = sums[3] - float(pad)

    mu_d = sum_d * inv_n
    mu_t = sum_t * inv_n
    var_d = jnp.maximum(sum_d2 * inv_n - mu_d * mu_d, 0.0)   # biased (train BN)
    var_t = jnp.maximum(sum_t2 * inv_n - mu_t * mu_t, 0.0)

    # ---- fold BatchNorm + Linear heads into 6 scalars ------------------------
    bn_w0, bn_w1, bn_b0, bn_b1 = params[0], params[1], params[2], params[3]
    w10, w11, b1 = params[4], params[5], params[6]
    w20, w21, b2 = params[7], params[8], params[9]

    g0 = bn_w0 * jax.lax.rsqrt(var_d + _EPS)
    g1 = bn_w1 * jax.lax.rsqrt(var_t + _EPS)
    h0 = bn_b0 - g0 * mu_d
    h1 = bn_b1 - g1 * mu_t

    coeffs = jnp.stack([
        w10 * g0, w11 * g1, w10 * h0 + w11 * h1 + b1,
        w20 * g0, w21 * g1, w20 * h0 + w21 * h1 + b2,
    ]).astype(jnp.float32)

    # ---- pass 2: tiled, lane-dense elementwise head --------------------------
    out2d = pl.pallas_call(
        _head_kernel,
        out_shape=jax.ShapeDtypeStruct((padded_rows, _LANES), jnp.float32),
        grid=(grid,),
        in_specs=[
            pl.BlockSpec(memory_space=pltpu.MemorySpace.SMEM),   # coeffs (6,)
            blk, blk, blk,
        ],
        out_specs=blk,
        compiler_params=pltpu.CompilerParams(
            dimension_semantics=("parallel",)),
    )(coeffs, sa, sb, tm)

    return out2d.reshape(-1)[:n].reshape(n, 1)


def _pownet_reference(x, params):
    """Plain-JAX mirror of the PyTorch module (train-mode BatchNorm)."""
    t = x[:, 2]
    for _ in range(10):
        t = jnp.where(t <= 0.0, t + 300.0, t)
    time_left = t / 2880.0
    score_diff = x[:, 0] - x[:, 1]
    sv = jnp.stack([score_diff, time_left], axis=1)
    mu = jnp.mean(sv, axis=0)
    var = jnp.mean((sv - mu) ** 2, axis=0)
    svn = (sv - mu) / jnp.sqrt(var + _EPS) * params[0:2] + params[2:4]
    o1 = svn @ params[4:6] + params[6]
    o2 = (svn @ params[7:9] + params[9]) / jnp.sqrt(time_left)
    return jax.nn.sigmoid(o1 + o2).reshape(-1, 1)


def init_params():
    """Deterministic parameter init mirroring the torch module's shapes."""
    key = jax.random.PRNGKey(0)
    k1, k2, k3, k4 = jax.random.split(key, 4)
    bound = 1.0 / jnp.sqrt(2.0)                      # PyTorch Linear(in=2) bound
    bn_w = jnp.ones((2,), jnp.float32)               # BatchNorm1d defaults
    bn_b = jnp.zeros((2,), jnp.float32)
    w1 = jax.random.uniform(k1, (2,), jnp.float32, -bound, bound)
    b1 = jax.random.uniform(k2, (1,), jnp.float32, -bound, bound)
    w2 = jax.random.uniform(k3, (2,), jnp.float32, -bound, bound)
    b2 = jax.random.uniform(k4, (1,), jnp.float32, -bound, bound)
    return jnp.concatenate([bn_w, bn_b, w1, b1, w2, b2]).astype(jnp.float32)


if __name__ == "__main__":
    key = jax.random.PRNGKey(0)
    ka, kb, kt = jax.random.split(key, 3)
    N = 8
    score_a = jax.random.uniform(ka, (N, 1), jnp.float32, 0.0, 120.0)
    score_b = jax.random.uniform(kb, (N, 1), jnp.float32, 0.0, 120.0)
    # include some non-positive times to exercise the "+300" correction
    time_col = jax.random.uniform(kt, (N, 1), jnp.float32, -200.0, 2880.0)
    x = jnp.concatenate([score_a, score_b, time_col], axis=1)   # (N, 3)

    params = init_params()
    out = pownet_forward(x, params)
    jax.block_until_ready(out)

    assert out.shape == (N, 1) and out.dtype == jnp.float32
    assert bool(jnp.all(jnp.isfinite(out)))
    ref = _pownet_reference(x, params)
    assert bool(jnp.allclose(out, ref, rtol=0.0, atol=5e-3)), (out, ref)
    print("KERNEL_OK")
</pallas_src>

<mosaic_0001>
module attributes {stable_mosaic.version = 11 : i64} {
  func.func @_stats_kernel(%arg0: i32, %arg1: memref<8x128xf32, #tpu.memory_space<vmem>>, %arg2: memref<8x128xf32, #tpu.memory_space<vmem>>, %arg3: memref<8x128xf32, #tpu.memory_space<vmem>>, %arg4: memref<1x8x128xf32, #tpu.memory_space<vmem>>) attributes {dimension_semantics = [#tpu.dimension_semantics<parallel>], iteration_bounds = array<i64: 1>, scalar_prefetch = 0 : i64, scratch_operands = 0 : i64, tpu.core_type = #tpu.core_type<tc>, window_params = [{transform_indices = @transform_0, window_bounds = array<i64: 8, 128>}, {transform_indices = @transform_1, window_bounds = array<i64: 8, 128>}, {transform_indices = @transform_2, window_bounds = array<i64: 8, 128>}, {transform_indices = @transform_3, window_bounds = array<i64: 1, 8, 128>}]} {
    %c0 = arith.constant 0 : index
    %c0_0 = arith.constant 0 : index
    %0 = vector.load %arg1[%c0, %c0_0] : memref<8x128xf32, #tpu.memory_space<vmem>>, vector<8x128xf32>
    %c0_1 = arith.constant 0 : index
    %c0_2 = arith.constant 0 : index
    %1 = vector.load %arg2[%c0_1, %c0_2] : memref<8x128xf32, #tpu.memory_space<vmem>>, vector<8x128xf32>
    %2 = arith.subf %0, %1 : vector<8x128xf32>
    %c0_3 = arith.constant 0 : index
    %c0_4 = arith.constant 0 : index
    %3 = vector.load %arg3[%c0_3, %c0_4] : memref<8x128xf32, #tpu.memory_space<vmem>>, vector<8x128xf32>
    %cst = arith.constant 0.000000e+00 : f32
    %4 = vector.broadcast %cst : f32 to vector<8x128xf32>
    %5 = arith.cmpf ole, %3, %4 : vector<8x128xf32>
    %cst_5 = arith.constant 0.000000e+00 : f32
    %6 = vector.broadcast %cst_5 : f32 to vector<8x128xf32>
    %7 = arith.subf %6, %3 : vector<8x128xf32>
    %cst_6 = arith.constant 3.000000e+02 : f32
    %8 = vector.broadcast %cst_6 : f32 to vector<8x128xf32>
    %9 = arith.divf %7, %8 : vector<8x128xf32>
    %10 = math.floor %9 : vector<8x128xf32>
    %cst_7 = arith.constant 1.000000e+00 : f32
    %11 = vector.broadcast %cst_7 : f32 to vector<8x128xf32>
    %12 = arith.addf %10, %11 : vector<8x128xf32>
    %cst_8 = arith.constant 1.000000e+01 : f32
    %13 = vector.broadcast %cst_8 : f32 to vector<8x128xf32>
    %14 = arith.minimumf %12, %13 : vector<8x128xf32>
    %cst_9 = arith.constant 0.000000e+00 : f32
    %15 = vector.broadcast %cst_9 : f32 to vector<8x128xf32>
    %16 = arith.select %5, %14, %15 : vector<8x128xi1>, vector<8x128xf32>
    %cst_10 = arith.constant 3.000000e+02 : f32
    %17 = vector.broadcast %cst_10 : f32 to vector<8x128xf32>
    %18 = arith.mulf %17, %16 : vector<8x128xf32>
    %19 = arith.addf %3, %18 : vector<8x128xf32>
    %cst_11 = arith.constant 3.47222231E-4 : f32
    %20 = vector.broadcast %cst_11 : f32 to vector<8x128xf32>
    %21 = arith.mulf %19, %20 : vector<8x128xf32>
    %cst_12 = arith.constant dense<0.000000e+00> : vector<128xf32>
    %22 = vector.multi_reduction <add>, %2, %cst_12 [0] : vector<8x128xf32> to vector<128xf32>
    %23 = vector.shape_cast %22 : vector<128xf32> to vector<1x128xf32>
    %c0_13 = arith.constant 0 : index
    %c0_14 = arith.constant 0 : index
    %c0_15 = arith.constant 0 : index
    %24 = vector.load %arg4[%c0_13, %c0_14, %c0_15] : memref<1x8x128xf32, #tpu.memory_space<vmem>>, vector<1x1x128xf32>
    %25 = vector.shape_cast %24 : vector<1x1x128xf32> to vector<1x128xf32>
    %26 = vector.shape_cast %23 : vector<1x128xf32> to vector<1x1x128xf32>
    tpu.vector_store %arg4[%c0_13, %c0_14, %c0_15], %26 {strides = array<i32>} : memref<1x8x128xf32, #tpu.memory_space<vmem>>, vector<1x1x128xf32>,
    %27 = arith.mulf %2, %2 : vector<8x128xf32>
    %cst_16 = arith.constant dense<0.000000e+00> : vector<128xf32>
    %28 = vector.multi_reduction <add>, %27, %cst_16 [0] : vector<8x128xf32> to vector<128xf32>
    %29 = vector.shape_cast %28 : vector<128xf32> to vector<1x128xf32>
    %c0_17 = arith.constant 0 : index
    %c1 = arith.constant 1 : index
    %c0_18 = arith.constant 0 : index
    %30 = vector.load %arg4[%c0_17, %c1, %c0_18] : memref<1x8x128xf32, #tpu.memory_space<vmem>>, vector<1x1x128xf32>
    %31 = vector.shape_cast %30 : vector<1x1x128xf32> to vector<1x128xf32>
    %32 = vector.shape_cast %29 : vector<1x128xf32> to vector<1x1x128xf32>
    tpu.vector_store %arg4[%c0_17, %c1, %c0_18], %32 {strides = array<i32>} : memref<1x8x128xf32, #tpu.memory_space<vmem>>, vector<1x1x128xf32>,
    %cst_19 = arith.constant dense<0.000000e+00> : vector<128xf32>
    %33 = vector.multi_reduction <add>, %21, %cst_19 [0] : vector<8x128xf32> to vector<128xf32>
    %34 = vector.shape_cast %33 : vector<128xf32> to vector<1x128xf32>
    %c0_20 = arith.constant 0 : index
    %c2 = arith.constant 2 : index
    %c0_21 = arith.constant 0 : index
    %35 = vector.load %arg4[%c0_20, %c2, %c0_21] : memref<1x8x128xf32, #tpu.memory_space<vmem>>, vector<1x1x128xf32>
    %36 = vector.shape_cast %35 : vector<1x1x128xf32> to vector<1x128xf32>
    %37 = vector.shape_cast %34 : vector<1x128xf32> to vector<1x1x128xf32>
    tpu.vector_store %arg4[%c0_20, %c2, %c0_21], %37 {strides = array<i32>} : memref<1x8x128xf32, #tpu.memory_space<vmem>>, vector<1x1x128xf32>,
    %38 = arith.mulf %21, %21 : vector<8x128xf32>
    %cst_22 = arith.constant dense<0.000000e+00> : vector<128xf32>
    %39 = vector.multi_reduction <add>, %38, %cst_22 [0] : vector<8x128xf32> to vector<128xf32>
    %40 = vector.shape_cast %39 : vector<128xf32> to vector<1x128xf32>
    %c0_23 = arith.constant 0 : index
    %c3 = arith.constant 3 : index
    %c0_24 = arith.constant 0 : index
    %41 = vector.load %arg4[%c0_23, %c3, %c0_24] : memref<1x8x128xf32, #tpu.memory_space<vmem>>, vector<1x1x128xf32>
    %42 = vector.shape_cast %41 : vector<1x1x128xf32> to vector<1x128xf32>
    %43 = vector.shape_cast %40 : vector<1x128xf32> to vector<1x1x128xf32>
    tpu.vector_store %arg4[%c0_23, %c3, %c0_24], %43 {strides = array<i32>} : memref<1x8x128xf32, #tpu.memory_space<vmem>>, vector<1x1x128xf32>,
    %cst_25 = arith.constant 0.000000e+00 : f32
    %44 = vector.broadcast %cst_25 : f32 to vector<4x128xf32>
    %c0_26 = arith.constant 0 : index
    %c4 = arith.constant 4 : index
    %c0_27 = arith.constant 0 : index
    %45 = vector.load %arg4[%c0_26, %c4, %c0_27] : memref<1x8x128xf32, #tpu.memory_space<vmem>>, vector<1x4x128xf32>
    %46 = vector.shape_cast %45 : vector<1x4x128xf32> to vector<4x128xf32>
    %47 = vector.shape_cast %44 : vector<4x128xf32> to vector<1x4x128xf32>
    tpu.vector_store %arg4[%c0_26, %c4, %c0_27], %47 {strides = array<i32>} : memref<1x8x128xf32, #tpu.memory_space<vmem>>, vector<1x4x128xf32>,
    return
  }
  func.func @transform_0(%arg0: i32) -> (i32, i32) {
    %c0_i32 = arith.constant 0 : i32
    %c0_i32_0 = arith.constant 0 : i32
    return %arg0, %c0_i32 : i32, i32
  }
  func.func @transform_1(%arg0: i32) -> (i32, i32) {
    %c0_i32 = arith.constant 0 : i32
    %c0_i32_0 = arith.constant 0 : i32
    return %arg0, %c0_i32 : i32, i32
  }
  func.func @transform_2(%arg0: i32) -> (i32, i32) {
    %c0_i32 = arith.constant 0 : i32
    %c0_i32_0 = arith.constant 0 : i32
    return %arg0, %c0_i32 : i32, i32
  }
  func.func @transform_3(%arg0: i32) -> (i32, i32, i32) {
    %c0_i32 = arith.constant 0 : i32
    %c0_i32_0 = arith.constant 0 : i32
    %c0_i32_1 = arith.constant 0 : i32
    return %arg0, %c0_i32, %c0_i32_0 : i32, i32, i32
  }
}

</mosaic_0001>

<bundles_post_ra>
// kernel: tpu_custom_call.1
= control target key start
LH: loop header
LB: loop body
LE: loop exit
PB: predicated region body
PF: predicated region fallthrough
CT: control target
= control target key end

     0   :  { %8 = vsyncpa [#allocation3], 0  ;;  %s274_s0 = inlined_call_operand.hbm [shape: f32[8,128], index: 0, kind: input, shape index: {}]   ;;  %s275_s1 = inlined_call_operand.hbm [shape: f32[8,128], index: 1, kind: input, shape index: {}]   ;;  %s276_s2 = inlined_call_operand.hbm [shape: f32[8,128], index: 2, kind: input, shape index: {}]   ;;  %s277_s3 = inlined_call_operand.hbm [shape: f32[1,8,128], index: 3, kind: output, shape index: {}]  }
   0x1   :  { %9 = vsyncpa [#allocation6], 0  ;;  %s27_s14 = sshll.u32 %s275_s1, 4  ;;  %s28_s14 = int_to_ptr.hbm [resolvable:$true] %s27_s14 }
   0x2   :  { %10 = vsyncpa [#allocation4], 0  ;;  %s236_s15 = smov [#allocation5]   ;;  %s16_s19 = sshll.u32 %s274_s0, 4  ;;  %s17_s19 = int_to_ptr.hbm [resolvable:$true] %s16_s19 }
   0x3   :  { %s29_s16 = sshll.u32 %s236_s15, 4  ;;  %s237_s20 = smov [#allocation2]   ;;  %s30_s16 = int_to_ptr.vmem [resolvable:$true] %s29_s16 }
   0x4   :  { %32 = dma.hbm_to_vmem [thread:$0]  %s28_s14, 128, %s30_s16, [#allocation6]  }
   0x5   :  { %s18_s21 = sshll.u32 %s237_s20, 4  ;;  %s38_s24 = sshll.u32 %s276_s2, 4  ;;  %s19_s21 = int_to_ptr.vmem [resolvable:$true] %s18_s21  ;;  %s39_s24 = int_to_ptr.hbm [resolvable:$true] %s38_s24 }
   0x6   :  { %21 = dma.hbm_to_vmem [thread:$0]  %s17_s19, 128, %s19_s21, [#allocation3]  }
   0x7   :  { %s238_s1 = smov [#allocation7]  }
   0x8   :  { %s40_s25 = sshll.u32 %s238_s1, 4  ;;  %s41_s25 = int_to_ptr.vmem [resolvable:$true] %s40_s25 }
   0x9   :  { %43 = dma.hbm_to_vmem [thread:$0]  %s39_s24, 128, %s41_s25, [#allocation6]  }
   0xa   :  { %230 = dma.done.wait [#allocation3], 128  }
   0xb   :  { %231 = vsyncadd [#allocation3], 4294967168 }
   0xc   :  { %232 = dma.done.wait [#allocation6], 256  }
   0xd   :  { %233 = vsyncadd [#allocation6], 4294967040  ;;  %v239_v0 = vmov 300.0   ;;  %v56_v2 = vld [vmem:[#allocation2] sm:$0xff]  ;;  %v57_v3 = vld [vmem:[#allocation5] sm:$0xff]  ;;  %v240_v17 = vmov 0.0  }
   0xe   :  { %132 = vrcp.f32 %v239_v0  ;;  %v58_v4 = vsub.f32 %v56_v2, %v57_v3  ;;  %v59_v8 = vld [vmem:[#allocation7] sm:$0xff]  ;;  %107 = vst [vmem:[#allocation8 + $0x4] sm:$0xf] %v240_v17  ;;  %s241_s0 = smov [#allocation8]   ;;  %s115_s28 = sshll.u32 %s277_s3, 4  ;;  %s116_s28 = int_to_ptr.hbm [resolvable:$true] %s115_s28 }
   0xf   :  { %v61_v13 = vsub.f32 0.0, %v59_v8  ;;  %vm60_vm1 = vcmp.le.f32.partialorder %v59_v8, 0.0  ;;  %s113_s2 = sshll.u32 %s241_s0, 4  ;;  %s114_s2 = int_to_ptr.vmem [resolvable:$true] %s113_s2 }
  0x10   :  { %v77_v6 = vrot.slane %v58_v4, 4  ;;  %v84_v7 = vmul.f32 %v58_v4, %v58_v4 }
  0x12   :  { %v78_v10 = vadd.f32 %v77_v6, %v58_v4  ;;  %v85_v11 = vrot.slane %v84_v7, 4 }
  0x14   :  { %v133_v1 = vpop.eup %132  ;;  %v79_v14 = vrot.slane %v78_v10, 2  ;;  %v86_v15 = vadd.f32 %v85_v11, %v84_v7 }
  0x15   :  { %v63_v5 = vmul.f32 300.0, %v133_v1  ;;  %vm67_vm0 = vweird.f32 %v133_v1 }
  0x16   :  { %v80_v18 = vadd.f32 %v79_v14, %v78_v10  ;;  %v87_v19 = vrot.slane %v86_v15, 2 }
  0x17   :  { %v64_v9 = vsub.f32 1.0, %v63_v5 }
  0x18   :  { %v81_v22 = vrot.slane %v80_v18, 1  ;;  %v88_v23 = vadd.f32 %v87_v19, %v86_v15 }
  0x19   :  { %v65_v12 = vmul.f32 %v133_v1, %v64_v9 }
  0x1a   :  { %v82_v25 = vadd.f32 %v81_v22, %v80_v18  ;;  %v89_v26 = vrot.slane %v88_v23, 1 }
  0x1b   :  { %v66_v16 = vadd.f32 %v133_v1, %v65_v12 }
  0x1c   :  { %83 = vst [vmem:[#allocation8] sm:$0x1] %v82_v25  ;;  %v90_v28 = vadd.f32 %v89_v26, %v88_v23 }
  0x1d   :  { %v68_v20 = vsel %vm67_vm0, %v133_v1, %v66_v16 }
  0x1e   :  { %v69_v21 = vmul.f32 %v68_v20, %v61_v13  ;;  %91 = vst [vmem:[#allocation8 + $0x1] sm:$0x1] %v90_v28 }
  0x20   :  { %v70_v24 = vfloor.f32 %v69_v21 }
  0x22   :  { %v71_v27 = vadd.f32 1.0, %v70_v24 }
  0x24   :  { %v72_v29 = vmin.f32 %v71_v27, 10.0 }
  0x26   :  { %v73_v30 = vsel %vm60_vm1, %v72_v29, 0.0 }
  0x27   :  { %v74_v31 = vmul.f32 300.0, %v73_v30 }
  0x29   :  { %v75_v32 = vadd.f32 %v74_v31, %v59_v8 }
  0x2b   :  { %v76_v33 = vmul.f32 0.00034722223, %v75_v32 }
  0x2d   :  { %v92_v34 = vrot.slane %v76_v33, 4  ;;  %v99_v35 = vmul.f32 %v76_v33, %v76_v33 }
  0x2f   :  { %v93_v36 = vadd.f32 %v92_v34, %v76_v33  ;;  %v100_v37 = vrot.slane %v99_v35, 4 }
  0x31   :  { %v94_v38 = vrot.slane %v93_v36, 2  ;;  %v101_v39 = vadd.f32 %v100_v37, %v99_v35 }
  0x33   :  { %v95_v40 = vadd.f32 %v94_v38, %v93_v36  ;;  %v102_v41 = vrot.slane %v101_v39, 2 }
  0x35   :  { %v96_v42 = vrot.slane %v95_v40, 1  ;;  %v103_v43 = vadd.f32 %v102_v41, %v101_v39 }
  0x37   :  { %v97_v44 = vadd.f32 %v96_v42, %v95_v40  ;;  %v104_v45 = vrot.slane %v103_v43, 1 }
  0x39   :  { %98 = vst [vmem:[#allocation8 + $0x2] sm:$0x1] %v97_v44  ;;  %v105_v46 = vadd.f32 %v104_v45, %v103_v43 }
  0x3b   :  { %106 = vst [vmem:[#allocation8 + $0x3] sm:$0x1] %v105_v46 }
  0x3c   :  { %118 = dma.vmem_to_hbm [thread:$0]  %s114_s2, 128, %s116_s28, [#allocation4]  }
  0x3d   :  { %234 = dma.done.wait [#allocation4], 128  }
  0x3e   :  { %235 = vsyncadd [#allocation4], 4294967168 }
  0x3f   :  { %123 = vsyncpa [#allocation3], 1 }
  0x40   :  { %124 = vsyncpa [#allocation6], 1 }
  0x41   :  { %125 = vsyncpa [#allocation4], 1 }

</bundles_post_ra>
